<compile_context>
chip_gen: v7x
topology: tpu7x:2x2x1
jax: 0.10.0
libtpu: 0.0.40
codegen_flags: <defaults>
</compile_context>

<pallas_src>
import jax
import jax.numpy as jnp
from jax.experimental import pallas as pl
from jax.experimental.pallas import tpu as pltpu


def _relu_add_kernel(z_ref, u_ref, o_ref):
    # Elementwise hot path: relu(z + u) on the VPU. Memory-bound.
    s = z_ref[...] + u_ref[...]
    o_ref[...] = jnp.maximum(s, jnp.zeros((), s.dtype)).astype(o_ref.dtype)


def _round_down(x, m):
    return max(m, (x // m) * m)


def _choose_tiles(n_rows, n_cols, itemsize):
    """Pick (tile_rows, tile_cols) so 3 operands x 2 pipeline buffers stay
    ~12 MiB -> safely under the default scoped-VMEM budget on all generations."""
    block_budget = 2 * 1024 * 1024  # bytes per operand per block
    # Minimum sublane tile: f32 -> 8 rows, bf16 -> 16 rows, int8/fp8 -> 32 rows.
    min_rows = max(8, 32 // max(1, itemsize))

    # Only tile the feature axis when even a minimum-height slab of full C
    # would blow the budget, and only in lane-dense (multiple-of-128) chunks.
    if n_cols % 128 == 0 and min_rows * n_cols * itemsize > block_budget:
        tile_cols = _round_down(block_budget // (min_rows * itemsize), 128)
        tile_cols = min(tile_cols, n_cols)
    else:
        tile_cols = n_cols  # full feature dim is always a legal block dim

    rows_budget = max(min_rows, block_budget // max(1, tile_cols * itemsize))
    if n_rows <= rows_budget:
        tile_rows = n_rows  # single block along rows (full dim always legal)
    else:
        tile_rows = _round_down(rows_budget, min_rows)
    return tile_rows, tile_cols


def ffn_filter_forward(z, u, *, tile_rows=None, tile_cols=None,
                       vmem_limit_bytes=None):
    """FFNFilter.forward: relu(z + u).

    Accepts any rank >= 1; leading dims are flattened to rows and the last
    dim is kept as the (lane) feature axis, then tiled 2-D over (rows, C).
    """
    assert z.shape == u.shape, "z and u must have identical shapes"
    assert z.dtype == u.dtype, "z and u must have identical dtypes"

    orig_shape = z.shape
    if z.ndim == 1:
        z2 = z.reshape(1, -1)
        u2 = u.reshape(1, -1)
    else:
        z2 = z.reshape(-1, orig_shape[-1])
        u2 = u.reshape(-1, orig_shape[-1])

    N, C = z2.shape
    itemsize = jnp.dtype(z2.dtype).itemsize

    auto_rows, auto_cols = _choose_tiles(N, C, itemsize)
    tr = tile_rows if tile_rows is not None else auto_rows
    tc = tile_cols if tile_cols is not None else auto_cols

    grid = (pl.cdiv(N, tr), pl.cdiv(C, tc))
    block = pl.BlockSpec((tr, tc), lambda i, j: (i, j))

    out = pl.pallas_call(
        _relu_add_kernel,
        out_shape=jax.ShapeDtypeStruct((N, C), z2.dtype),
        grid=grid,
        in_specs=[block, block],
        out_specs=pl.BlockSpec((tr, tc), lambda i, j: (i, j)),
        compiler_params=pltpu.CompilerParams(
            dimension_semantics=("parallel", "parallel"),
            vmem_limit_bytes=vmem_limit_bytes,
        ),
    )(z2, u2)
    return out.reshape(orig_shape)


def init_ffn_filter_params(key, in_channels=2, interm_channels=256, scale=10.0):
    """Deterministic parameter init mirroring FFNFilter.__init__.
    These parameters are NOT used by forward (matches the PyTorch module)."""
    embedding_size = interm_channels // 2
    k_b, k_w, k_bias = jax.random.split(key, 3)
    bval = jax.random.normal(k_b, (in_channels, embedding_size), jnp.float32) * 10.0
    aval = jnp.ones((embedding_size,), jnp.float32)
    out_channels = embedding_size * 2
    # nn.Linear(out_channels, interm_channels): uniform(-1/sqrt(fan_in), 1/sqrt(fan_in))
    bound = 1.0 / jnp.sqrt(jnp.float32(out_channels))
    w = jax.random.uniform(k_w, (interm_channels, out_channels), jnp.float32, -bound, bound)
    b = jax.random.uniform(k_bias, (interm_channels,), jnp.float32, -bound, bound)
    return {"bval": bval, "aval": aval, "x_map_w": w, "x_map_b": b}


if __name__ == "__main__":
    key = jax.random.PRNGKey(0)
    k_params, k_z, k_u = jax.random.split(key, 3)

    # Unused-in-forward parameters, initialized per __init__ shapes.
    _params = init_ffn_filter_params(k_params, in_channels=2, interm_channels=256)

    # Small demo inputs: N rows of interm_channels features (z, u from the DEQ loop).
    # At this size the adaptive tiler collapses the grid to a single block.
    N, C = 16, 256
    z = jax.random.normal(k_z, (N, C), jnp.float32)
    u = jax.random.normal(k_u, (N, C), jnp.float32)

    out = ffn_filter_forward(z, u)
    out = jax.block_until_ready(out)

    # Correctness check against pure-JAX reference.
    ref = jnp.maximum(z + u, 0.0)
    assert out.shape == (N, C)
    assert out.dtype == z.dtype
    assert jnp.allclose(out, ref, atol=1e-6), "mismatch vs reference"

    print("KERNEL_OK")
</pallas_src>

<mosaic_0001>
module attributes {stable_mosaic.version = 11 : i64} {
  func.func @_relu_add_kernel(%arg0: i32, %arg1: i32, %arg2: memref<16x256xf32, #tpu.memory_space<vmem>>, %arg3: memref<16x256xf32, #tpu.memory_space<vmem>>, %arg4: memref<16x256xf32, #tpu.memory_space<vmem>>) attributes {dimension_semantics = [#tpu.dimension_semantics<parallel>, #tpu.dimension_semantics<parallel>], iteration_bounds = array<i64: 1, 1>, scalar_prefetch = 0 : i64, scratch_operands = 0 : i64, tpu.core_type = #tpu.core_type<tc>, window_params = [{transform_indices = @transform_0, window_bounds = array<i64: 16, 256>}, {transform_indices = @transform_1, window_bounds = array<i64: 16, 256>}, {transform_indices = @transform_2, window_bounds = array<i64: 16, 256>}]} {
    %c0 = arith.constant 0 : index
    %c0_0 = arith.constant 0 : index
    %0 = vector.load %arg2[%c0, %c0_0] : memref<16x256xf32, #tpu.memory_space<vmem>>, vector<16x256xf32>
    %c0_1 = arith.constant 0 : index
    %c0_2 = arith.constant 0 : index
    %1 = vector.load %arg3[%c0_1, %c0_2] : memref<16x256xf32, #tpu.memory_space<vmem>>, vector<16x256xf32>
    %2 = arith.addf %0, %1 : vector<16x256xf32>
    %cst = arith.constant 0.000000e+00 : f32
    %3 = vector.broadcast %cst : f32 to vector<16x256xf32>
    %4 = arith.maximumf %2, %3 : vector<16x256xf32>
    %c0_3 = arith.constant 0 : index
    %c0_4 = arith.constant 0 : index
    %5 = vector.load %arg4[%c0_3, %c0_4] : memref<16x256xf32, #tpu.memory_space<vmem>>, vector<16x256xf32>
    tpu.vector_store %arg4[%c0_3, %c0_4], %4 {strides = array<i32>} : memref<16x256xf32, #tpu.memory_space<vmem>>, vector<16x256xf32>,
    return
  }
  func.func @transform_0(%arg0: i32, %arg1: i32) -> (i32, i32) {
    %c0_i32 = arith.constant 0 : i32
    return %arg0, %arg1 : i32, i32
  }
  func.func @transform_1(%arg0: i32, %arg1: i32) -> (i32, i32) {
    %c0_i32 = arith.constant 0 : i32
    return %arg0, %arg1 : i32, i32
  }
  func.func @transform_2(%arg0: i32, %arg1: i32) -> (i32, i32) {
    %c0_i32 = arith.constant 0 : i32
    return %arg0, %arg1 : i32, i32
  }
}

</mosaic_0001>

<bundles_post_ra>
// kernel: tpu_custom_call.1
= control target key start
LH: loop header
LB: loop body
LE: loop exit
PB: predicated region body
PF: predicated region fallthrough
CT: control target
= control target key end

     0   :  { %7 = vsyncpa [#allocation3], 0  ;;  %s220_s0 = inlined_call_operand.hbm [shape: f32[16,256], index: 0, kind: input, shape index: {}]   ;;  %s221_s1 = inlined_call_operand.hbm [shape: f32[16,256], index: 1, kind: input, shape index: {}]   ;;  %s222_s2 = inlined_call_operand.hbm [shape: f32[16,256], index: 2, kind: output, shape index: {}]  }
   0x1   :  { %8 = vsyncpa [#allocation6], 0 }
   0x2   :  { %9 = vsyncpa [#allocation4], 0  ;;  %s155_s9 = smov [#allocation2]   ;;  %s83_s13 = scalar_lea.hbm %s220_s0, 512 }
   0x3   :  { %s15_s10 = sshll.u32 %s155_s9, 4  ;;  %p84_p0 = scmp.ne.s32.totalorder %s220_s0, %s83_s13  ;;  %s16_s10 = int_to_ptr.vmem [resolvable:$true] %s15_s10 }
   0x4   :  { %p87_p1 = scmp.lt.u32.totalorder %s83_s13, %s220_s0 }
   0x6   :  { %p89_p2 = pnand %p87_p1, %p84_p0 }
   0x8   :  { %92 = shalt.err (!%p89_p2)
}
   0x9   :  { %s93_s18 = scalar_lea.vmem %s16_s10, 512  ;;  %p98_p4 = scmp.lt.s32.totalorder %s16_s10, %s16_s10 }
   0xa   :  { %p94_p3 = scmp.ne.s32.totalorder %s16_s10, %s93_s18  ;;  %p99_p5 = scmp.lt.s32.totalorder %s93_s18, %s93_s18 }
   0xc   :  { %p100_p6 = por %p99_p5, %p98_p4 }
   0xe   :  { %p101_p7 = pnand %p100_p6, %p94_p3 }
  0x10   :  { %104 = shalt.err (!%p101_p7)
}
  0x11   :  { %s156_s19 = smov 256   ;;  %s157_s20 = smov 16  }
  0x12   :  { %21 = dma.hbm_to_vmem [thread:$0]  %s220_s0, 512, %s16_s10, [#allocation3], %s156_s19, %s156_s19, %s157_s20  }
  0x13   :  { %s158_s23 = smov [#allocation5]   ;;  %s105_s27 = scalar_lea.hbm %s221_s1, 512 }
  0x14   :  { %s27_s24 = sshll.u32 %s158_s23, 4  ;;  %p106_p8 = scmp.ne.s32.totalorder %s221_s1, %s105_s27  ;;  %s28_s24 = int_to_ptr.vmem [resolvable:$true] %s27_s24 }
  0x15   :  { %p109_p9 = scmp.lt.u32.totalorder %s105_s27, %s221_s1 }
  0x17   :  { %p111_p10 = pnand %p109_p9, %p106_p8 }
  0x19   :  { %114 = shalt.err (!%p111_p10)
}
  0x1a   :  { %s115_s4 = scalar_lea.vmem %s28_s24, 512  ;;  %p120_p12 = scmp.lt.s32.totalorder %s28_s24, %s28_s24 }
  0x1b   :  { %p116_p11 = scmp.ne.s32.totalorder %s28_s24, %s115_s4  ;;  %p121_p13 = scmp.lt.s32.totalorder %s115_s4, %s115_s4 }
  0x1d   :  { %p122_p0 = por %p121_p13, %p120_p12 }
  0x1f   :  { %p123_p1 = pnand %p122_p0, %p116_p11 }
  0x21   :  { %126 = shalt.err (!%p123_p1)
}
  0x22   :  { %33 = dma.hbm_to_vmem [thread:$0]  %s221_s1, 512, %s28_s24, [#allocation6], %s156_s19, %s156_s19, %s157_s20  }
  0x23   :  { %149 = dma.done.wait [#allocation3], 512  }
  0x24   :  { %150 = vsyncadd [#allocation3], 4294966784 }
  0x25   :  { %151 = dma.done.wait [#allocation6], 512  }
  0x26   :  { %152 = vsyncadd [#allocation6], 4294966784  ;;  %v40_v0 = vld [vmem:[#allocation2] sm:$0xff]  ;;  %v41_v2 = vld [vmem:[#allocation2 + $0x8] sm:$0xff]  ;;  %s159_s6 = smov [#allocation7]  }
  0x27   :  { %v44_v1 = vld [vmem:[#allocation5] sm:$0xff]  ;;  %v45_v4 = vld [vmem:[#allocation5 + $0x8] sm:$0xff]  ;;  %v42_v5 = vld [vmem:[#allocation2 + $0x10] sm:$0xff]  ;;  %s65_s7 = sshll.u32 %s159_s6, 4  ;;  %s66_s7 = int_to_ptr.vmem [resolvable:$true] %s65_s7 }
  0x28   :  { %v48_v3 = vadd.f32 %v44_v1, %v40_v0  ;;  %v46_v6 = vld [vmem:[#allocation5 + $0x10] sm:$0xff]  ;;  %v49_v7 = vadd.f32 %v45_v4, %v41_v2  ;;  %v43_v9 = vld [vmem:[#allocation2 + $0x18] sm:$0xff]  ;;  %s127_s1 = scalar_lea.vmem %s66_s7, 512  ;;  %p132_p3 = scmp.lt.s32.totalorder %s66_s7, %s66_s7 }
  0x29   :  { %v50_v8 = vadd.f32 %v46_v6, %v42_v5  ;;  %v47_v10 = vld [vmem:[#allocation5 + $0x18] sm:$0xff]  ;;  %p128_p2 = scmp.ne.s32.totalorder %s66_s7, %s127_s1  ;;  %p133_p4 = scmp.lt.s32.totalorder %s127_s1, %s127_s1 }
  0x2a   :  { %v52_v11 = vmax.f32 %v48_v3, 0.0  ;;  %v51_v12 = vadd.f32 %v47_v10, %v43_v9  ;;  %v53_v13 = vmax.f32 %v49_v7, 0.0 }
  0x2b   :  { %v54_v14 = vmax.f32 %v50_v8, 0.0  ;;  %p134_p5 = por %p133_p4, %p132_p3 }
  0x2c   :  { %56 = vst [vmem:[#allocation7] sm:$0xff] %v52_v11  ;;  %v55_v15 = vmax.f32 %v51_v12, 0.0  ;;  %57 = vst [vmem:[#allocation7 + $0x8] sm:$0xff] %v53_v13 }
  0x2d   :  { %58 = vst [vmem:[#allocation7 + $0x10] sm:$0xff] %v54_v14  ;;  %p135_p6 = pnand %p134_p5, %p128_p2 }
  0x2e   :  { %59 = vst [vmem:[#allocation7 + $0x18] sm:$0xff] %v55_v15 }
  0x2f   :  { %138 = shalt.err (!%p135_p6)
}
  0x30   :  { %s139_s10 = scalar_lea.hbm %s222_s2, 512 }
  0x31   :  { %p140_p7 = scmp.ne.s32.totalorder %s222_s2, %s139_s10  ;;  %p143_p8 = scmp.lt.u32.totalorder %s139_s10, %s222_s2 }
  0x33   :  { %p145_p9 = pnand %p143_p8, %p140_p7 }
  0x35   :  { %148 = shalt.err (!%p145_p9)
}
  0x36   :  { %71 = dma.vmem_to_hbm [thread:$0]  %s66_s7, 512, %s222_s2, [#allocation4], %s156_s19, %s156_s19, %s157_s20  }
  0x37   :  { %153 = dma.done.wait [#allocation4], 512  }
  0x38   :  { %154 = vsyncadd [#allocation4], 4294966784 }
  0x39   :  { %75 = vsyncpa [#allocation3], 1 }
  0x3a   :  { %76 = vsyncpa [#allocation6], 1 }
  0x3b   :  { %77 = vsyncpa [#allocation4], 1 }

</bundles_post_ra>
